<compile_context>
chip_gen: v5e
topology: v5e:2x2
jax: 0.10.0
libtpu: 0.0.40
codegen_flags: <defaults>
</compile_context>

<pallas_src>
import functools

import jax
import jax.numpy as jnp
from jax.experimental import pallas as pl
from jax.experimental.pallas import tpu as pltpu


# ---------------------------------------------------------------------------
# Fused kernel: conv3x3(s2) + BN + ReLU6 -> dwconv3x3 + BN + ReLU6 -> conv1x1 + BN + ReLU6
# Slab layout: rows = Ho (one image per grid step), lanes = Wo*C.
# ---------------------------------------------------------------------------
def _make_fused_kernel(ho, wo, c1):
    wc1 = wo * c1

    def shift_w(t, dw):
        # shifted[r, wo*c1 + c] = t[r, (wo+dw)*c1 + c], zero where wo+dw is out of range.
        if dw == 0:
            return t
        zeros = jnp.zeros((ho, c1), jnp.float32)
        if dw > 0:
            return jnp.concatenate([t[:, c1:], zeros], axis=1)
        return jnp.concatenate([zeros, t[:, : wc1 - c1]], axis=1)

    def shift_h(t, dh):
        # shifted[r, :] = t[r+dh, :], zero where r+dh is out of range.
        if dh == 0:
            return t
        zeros = jnp.zeros((1, wc1), jnp.float32)
        if dh > 0:
            return jnp.concatenate([t[1:, :], zeros], axis=0)
        return jnp.concatenate([zeros, t[: ho - 1, :]], axis=0)

    def relu6(v):
        return jnp.minimum(jnp.maximum(v, 0.0), 6.0)

    def kernel(x_ref, w1_ref, s1_ref, b1_ref,
               wdw_ref, s2_ref, b2_ref,
               wpw_ref, s3_ref, b3_ref, o_ref):
        # Stage 1: 3x3 stride-2 conv as a lane-dense slab matmul (block-diagonal weights) on MXU.
        y1 = jnp.dot(x_ref[...], w1_ref[...], preferred_element_type=jnp.float32)
        y1 = relu6(y1 * s1_ref[...] + b1_ref[...])                       # (Ho, Wo*C1)

        # Stage 2: 3x3 depthwise (stride 1, pad 1) as 9 shifted MACs on the VMEM-resident slab.
        acc = y1 * wdw_ref[4]                                            # center tap (kh=1,kw=1)
        for k in range(9):
            if k == 4:
                continue
            dh, dw = k // 3 - 1, k % 3 - 1
            acc = acc + shift_h(shift_w(y1, dw), dh) * wdw_ref[k]
        y2 = relu6(acc * s2_ref[...] + b2_ref[...])                      # (Ho, Wo*C1)

        # Stage 3: 1x1 pointwise conv as a slab matmul (block-diagonal weights) on MXU.
        y3 = jnp.dot(y2, wpw_ref[...], preferred_element_type=jnp.float32)
        o_ref[...] = relu6(y3 * s3_ref[...] + b3_ref[...])               # (Ho, Wo*C2)

    return kernel


# ---------------------------------------------------------------------------
# Parameter init (deterministic synthetic, PyTorch layouts) + one-time packing to slab layout
# ---------------------------------------------------------------------------
def init_bottom_model_params(key):
    c_in, c_mid, c_out = 3, 32, 64
    k1, k2, k3 = jax.random.split(key, 3)
    params = {
        "conv1_w": jax.random.normal(k1, (c_mid, c_in, 3, 3), jnp.float32) * 0.1,   # OIHW
        "dw_w":    jax.random.normal(k2, (c_mid, 1, 3, 3), jnp.float32) * 0.1,      # C,1,H,W
        "pw_w":    jax.random.normal(k3, (c_out, c_mid, 1, 1), jnp.float32) * 0.1,  # OIHW
    }

    def folded_bn(c):
        gamma = 1.0 + 0.01 * jnp.arange(c, dtype=jnp.float32)
        beta = 0.01 * jnp.arange(c, dtype=jnp.float32)
        mean = jnp.zeros((c,), jnp.float32)
        var = jnp.ones((c,), jnp.float32)
        eps = 1e-5
        scale = gamma / jnp.sqrt(var + eps)
        bias = beta - mean * scale
        return scale, bias

    params["bn1_scale"], params["bn1_bias"] = folded_bn(c_mid)
    params["bn2_scale"], params["bn2_bias"] = folded_bn(c_mid)
    params["bn3_scale"], params["bn3_bias"] = folded_bn(c_out)
    return params


def _block_diag(mat, reps):
    r, c = mat.shape
    out = jnp.zeros((reps * r, reps * c), mat.dtype)
    for i in range(reps):
        out = out.at[i * r:(i + 1) * r, i * c:(i + 1) * c].set(mat)
    return out


def pack_bottom_model_params(params, wo):
    """One-time repack of PyTorch-layout weights into lane-dense slab form (call outside jit)."""
    c1 = params["conv1_w"].shape[0]
    # conv1: OIHW -> (kh,kw,cin,cout) -> (27, c1); block-diagonal over the Wo output columns.
    w1_mat = jnp.transpose(params["conv1_w"], (2, 3, 1, 0)).reshape(-1, c1)
    w1_big = _block_diag(w1_mat, wo)                                   # (Wo*27, Wo*c1)
    # depthwise taps: row k = kh*3+kw, lane q -> weight of channel q % c1.
    wdw = jnp.transpose(params["dw_w"][:, 0, :, :], (1, 2, 0)).reshape(9, c1)
    wdw_slab = jnp.tile(wdw, (1, wo)).reshape(9, 1, wo * c1)           # (9, 1, Wo*c1)
    # pointwise: (c1, c2); block-diagonal over Wo.
    wpw_mat = jnp.transpose(params["pw_w"][:, :, 0, 0], (1, 0))        # (c1, c2)
    wpw_big = _block_diag(wpw_mat, wo)                                 # (Wo*c1, Wo*c2)

    def tile_cb(v):
        return jnp.tile(v, (wo,)).reshape(1, -1)

    return {
        "w1": w1_big, "s1": tile_cb(params["bn1_scale"]), "b1": tile_cb(params["bn1_bias"]),
        "wdw": wdw_slab, "s2": tile_cb(params["bn2_scale"]), "b2": tile_cb(params["bn2_bias"]),
        "wpw": wpw_big, "s3": tile_cb(params["bn3_scale"]), "b3": tile_cb(params["bn3_bias"]),
    }


# ---------------------------------------------------------------------------
# Forward pass: thin im2col glue (conv1 input only) + one fused pallas_call
# ---------------------------------------------------------------------------
def bottom_model_forward_packed(packed, x_nchw):
    n, cin, h, w = x_nchw.shape
    ksize, stride, pad = 3, 2, 1
    ho = (h + 2 * pad - ksize) // stride + 1
    wo = (w + 2 * pad - ksize) // stride + 1
    c1 = packed["s2"].shape[1] // wo
    c2 = packed["s3"].shape[1] // wo
    k1 = ksize * ksize * cin

    # Input glue: NCHW -> NHWC, pad, strided im2col, lane-dense slab (N*Ho, Wo*27).
    x = jnp.transpose(x_nchw, (0, 2, 3, 1)).astype(jnp.float32)
    x = jnp.pad(x, ((0, 0), (pad, pad), (pad, pad), (0, 0)))
    cols = [x[:, kh:kh + stride * ho:stride, kw:kw + stride * wo:stride, :]
            for kh in range(ksize) for kw in range(ksize)]
    patches = jnp.stack(cols, axis=3)                                  # (N, Ho, Wo, 9, Cin)
    x_slab = patches.reshape(n * ho, wo * k1)                          # (N*Ho, Wo*27)

    kernel = _make_fused_kernel(ho, wo, c1)
    out_slab = pl.pallas_call(
        kernel,
        grid=(n,),
        in_specs=[
            pl.BlockSpec((ho, wo * k1), lambda i: (i, 0)),             # per-image x slab
            pl.BlockSpec(packed["w1"].shape, lambda i: (0, 0)),
            pl.BlockSpec(packed["s1"].shape, lambda i: (0, 0)),
            pl.BlockSpec(packed["b1"].shape, lambda i: (0, 0)),
            pl.BlockSpec(packed["wdw"].shape, lambda i: (0, 0, 0)),
            pl.BlockSpec(packed["s2"].shape, lambda i: (0, 0)),
            pl.BlockSpec(packed["b2"].shape, lambda i: (0, 0)),
            pl.BlockSpec(packed["wpw"].shape, lambda i: (0, 0)),
            pl.BlockSpec(packed["s3"].shape, lambda i: (0, 0)),
            pl.BlockSpec(packed["b3"].shape, lambda i: (0, 0)),
        ],
        out_specs=pl.BlockSpec((ho, wo * c2), lambda i: (i, 0)),       # lane-dense output slab
        out_shape=jax.ShapeDtypeStruct((n * ho, wo * c2), jnp.float32),
        compiler_params=pltpu.CompilerParams(dimension_semantics=("parallel",)),
    )(x_slab, packed["w1"], packed["s1"], packed["b1"],
      packed["wdw"], packed["s2"], packed["b2"],
      packed["wpw"], packed["s3"], packed["b3"])

    out = out_slab.reshape(n, ho, wo, c2)
    return jnp.transpose(out, (0, 3, 1, 2))                            # NHWC -> NCHW


def bottom_model_forward(params, x_nchw):
    """Bottom_Model.forward(x) == bottom_model(x) (convenience wrapper: packs then runs)."""
    h = x_nchw.shape[2]
    wo = (h + 2 * 1 - 3) // 2 + 1
    return bottom_model_forward_packed(pack_bottom_model_params(params, wo), x_nchw)


# ---------------------------------------------------------------------------
# Plain-JAX reference (for numerical verification of the fused kernel)
# ---------------------------------------------------------------------------
def bottom_model_reference(params, x_nchw):
    dn = ("NCHW", "OIHW", "NCHW")
    prec = jax.lax.Precision.HIGHEST

    def bn_relu6(y, s, b):
        return jnp.clip(y * s[None, :, None, None] + b[None, :, None, None], 0.0, 6.0)

    y = jax.lax.conv_general_dilated(x_nchw.astype(jnp.float32), params["conv1_w"],
                                     (2, 2), ((1, 1), (1, 1)),
                                     dimension_numbers=dn, precision=prec)
    y = bn_relu6(y, params["bn1_scale"], params["bn1_bias"])
    y = jax.lax.conv_general_dilated(y, params["dw_w"], (1, 1), ((1, 1), (1, 1)),
                                     dimension_numbers=dn,
                                     feature_group_count=params["dw_w"].shape[0],
                                     precision=prec)
    y = bn_relu6(y, params["bn2_scale"], params["bn2_bias"])
    y = jax.lax.conv_general_dilated(y, params["pw_w"], (1, 1), ((0, 0), (0, 0)),
                                     dimension_numbers=dn, precision=prec)
    return bn_relu6(y, params["bn3_scale"], params["bn3_bias"])


if __name__ == "__main__":
    key = jax.random.PRNGKey(0)
    pkey, xkey = jax.random.split(key)
    params = init_bottom_model_params(pkey)
    x = jax.random.normal(xkey, (2, 3, 16, 16), jnp.float32)           # NCHW, like PyTorch

    wo = (x.shape[2] + 2 * 1 - 3) // 2 + 1
    packed = pack_bottom_model_params(params, wo)                      # one-time repack (outside jit)

    fwd = jax.jit(functools.partial(bottom_model_forward_packed, packed))
    out = jax.block_until_ready(fwd(x))

    assert out.shape == (2, 64, 8, 8), out.shape
    assert bool(jnp.all(jnp.isfinite(out)))

    ref = bottom_model_reference(params, x)
    max_err = float(jnp.max(jnp.abs(out - ref)))
    assert jnp.allclose(out, ref, atol=2e-2, rtol=2e-2), max_err

    print("KERNEL_OK")
</pallas_src>

<mosaic_0001>
module attributes {stable_mosaic.version = 11 : i64} {
  func.func @kernel(%arg0: i32, %arg1: memref<8x216xf32, #tpu.memory_space<vmem>>, %arg2: memref<216x256xf32, #tpu.memory_space<vmem>>, %arg3: memref<1x256xf32, #tpu.memory_space<vmem>>, %arg4: memref<1x256xf32, #tpu.memory_space<vmem>>, %arg5: memref<9x1x256xf32, #tpu.memory_space<vmem>>, %arg6: memref<1x256xf32, #tpu.memory_space<vmem>>, %arg7: memref<1x256xf32, #tpu.memory_space<vmem>>, %arg8: memref<256x512xf32, #tpu.memory_space<vmem>>, %arg9: memref<1x512xf32, #tpu.memory_space<vmem>>, %arg10: memref<1x512xf32, #tpu.memory_space<vmem>>, %arg11: memref<8x512xf32, #tpu.memory_space<vmem>>) attributes {dimension_semantics = [#tpu.dimension_semantics<parallel>], iteration_bounds = array<i64: 2>, scalar_prefetch = 0 : i64, scratch_operands = 0 : i64, tpu.core_type = #tpu.core_type<tc>, window_params = [{transform_indices = @transform_0, window_bounds = array<i64: 8, 216>}, {pipeline_mode = #tpu.pipeline_mode<synchronous>, transform_indices = @transform_1, window_bounds = array<i64: 216, 256>}, {pipeline_mode = #tpu.pipeline_mode<synchronous>, transform_indices = @transform_2, window_bounds = array<i64: 1, 256>}, {pipeline_mode = #tpu.pipeline_mode<synchronous>, transform_indices = @transform_3, window_bounds = array<i64: 1, 256>}, {pipeline_mode = #tpu.pipeline_mode<synchronous>, transform_indices = @transform_4, window_bounds = array<i64: 9, 1, 256>}, {pipeline_mode = #tpu.pipeline_mode<synchronous>, transform_indices = @transform_5, window_bounds = array<i64: 1, 256>}, {pipeline_mode = #tpu.pipeline_mode<synchronous>, transform_indices = @transform_6, window_bounds = array<i64: 1, 256>}, {pipeline_mode = #tpu.pipeline_mode<synchronous>, transform_indices = @transform_7, window_bounds = array<i64: 256, 512>}, {pipeline_mode = #tpu.pipeline_mode<synchronous>, transform_indices = @transform_8, window_bounds = array<i64: 1, 512>}, {pipeline_mode = #tpu.pipeline_mode<synchronous>, transform_indices = @transform_9, window_bounds = array<i64: 1, 512>}, {transform_indices = @transform_10, window_bounds = array<i64: 8, 512>}]} {
    %c0 = arith.constant 0 : index
    %c0_0 = arith.constant 0 : index
    %0 = vector.load %arg1[%c0, %c0_0] : memref<8x216xf32, #tpu.memory_space<vmem>>, vector<8x216xf32>
    %c0_1 = arith.constant 0 : index
    %c0_2 = arith.constant 0 : index
    %1 = vector.load %arg2[%c0_1, %c0_2] : memref<216x256xf32, #tpu.memory_space<vmem>>, vector<216x256xf32>
    %cst = arith.constant dense<0.000000e+00> : vector<8x256xf32>
    %2 = tpu.matmul %0, %1, %cst {dimension_numbers = #tpu.dot_dimension_numbers<[1], [0], [0], [1], [0, 0, 1, 1], [], []>} : vector<8x216xf32>, vector<216x256xf32>, vector<8x256xf32> -> vector<8x256xf32>
    %c0_3 = arith.constant 0 : index
    %c0_4 = arith.constant 0 : index
    %3 = vector.load %arg3[%c0_3, %c0_4] : memref<1x256xf32, #tpu.memory_space<vmem>>, vector<1x256xf32>
    %4 = vector.broadcast %3 : vector<1x256xf32> to vector<8x256xf32>
    %5 = arith.mulf %2, %4 : vector<8x256xf32>
    %c0_5 = arith.constant 0 : index
    %c0_6 = arith.constant 0 : index
    %6 = vector.load %arg4[%c0_5, %c0_6] : memref<1x256xf32, #tpu.memory_space<vmem>>, vector<1x256xf32>
    %7 = vector.broadcast %6 : vector<1x256xf32> to vector<8x256xf32>
    %8 = arith.addf %5, %7 : vector<8x256xf32>
    %cst_7 = arith.constant 0.000000e+00 : f32
    %9 = vector.broadcast %cst_7 : f32 to vector<8x256xf32>
    %10 = arith.maximumf %8, %9 : vector<8x256xf32>
    %cst_8 = arith.constant 6.000000e+00 : f32
    %11 = vector.broadcast %cst_8 : f32 to vector<8x256xf32>
    %12 = arith.minimumf %10, %11 : vector<8x256xf32>
    %c4 = arith.constant 4 : index
    %c0_9 = arith.constant 0 : index
    %c0_10 = arith.constant 0 : index
    %13 = vector.load %arg5[%c4, %c0_9, %c0_10] : memref<9x1x256xf32, #tpu.memory_space<vmem>>, vector<1x1x256xf32>
    %14 = vector.shape_cast %13 : vector<1x1x256xf32> to vector<1x256xf32>
    %15 = vector.broadcast %14 : vector<1x256xf32> to vector<8x256xf32>
    %16 = arith.mulf %12, %15 : vector<8x256xf32>
    %cst_11 = arith.constant 0.000000e+00 : f32
    %17 = vector.broadcast %cst_11 : f32 to vector<8x32xf32>
    %18 = vector.extract_strided_slice %12 {offsets = [0, 0], sizes = [8, 224], strides = [1, 1]} : vector<8x256xf32> to vector<8x224xf32>
    %19 = tpu.concatenate %17, %18 in 1 : vector<8x32xf32>, vector<8x224xf32> -> vector<8x256xf32>
    %cst_12 = arith.constant 0.000000e+00 : f32
    %20 = vector.broadcast %cst_12 : f32 to vector<1x256xf32>
    %21 = vector.extract_strided_slice %19 {offsets = [0, 0], sizes = [7, 256], strides = [1, 1]} : vector<8x256xf32> to vector<7x256xf32>
    %22 = tpu.concatenate %20, %21 in 0 : vector<1x256xf32>, vector<7x256xf32> -> vector<8x256xf32>
    %c0_13 = arith.constant 0 : index
    %c0_14 = arith.constant 0 : index
    %c0_15 = arith.constant 0 : index
    %23 = vector.load %arg5[%c0_13, %c0_14, %c0_15] : memref<9x1x256xf32, #tpu.memory_space<vmem>>, vector<1x1x256xf32>
    %24 = vector.shape_cast %23 : vector<1x1x256xf32> to vector<1x256xf32>
    %25 = vector.broadcast %24 : vector<1x256xf32> to vector<8x256xf32>
    %26 = arith.mulf %22, %25 : vector<8x256xf32>
    %27 = arith.addf %16, %26 : vector<8x256xf32>
    %cst_16 = arith.constant 0.000000e+00 : f32
    %28 = vector.broadcast %cst_16 : f32 to vector<1x256xf32>
    %29 = vector.extract_strided_slice %12 {offsets = [0, 0], sizes = [7, 256], strides = [1, 1]} : vector<8x256xf32> to vector<7x256xf32>
    %30 = tpu.concatenate %28, %29 in 0 : vector<1x256xf32>, vector<7x256xf32> -> vector<8x256xf32>
    %c1 = arith.constant 1 : index
    %c0_17 = arith.constant 0 : index
    %c0_18 = arith.constant 0 : index
    %31 = vector.load %arg5[%c1, %c0_17, %c0_18] : memref<9x1x256xf32, #tpu.memory_space<vmem>>, vector<1x1x256xf32>
    %32 = vector.shape_cast %31 : vector<1x1x256xf32> to vector<1x256xf32>
    %33 = vector.broadcast %32 : vector<1x256xf32> to vector<8x256xf32>
    %34 = arith.mulf %30, %33 : vector<8x256xf32>
    %35 = arith.addf %27, %34 : vector<8x256xf32>
    %cst_19 = arith.constant 0.000000e+00 : f32
    %36 = vector.broadcast %cst_19 : f32 to vector<8x32xf32>
    %37 = vector.extract_strided_slice %12 {offsets = [0, 32], sizes = [8, 224], strides = [1, 1]} : vector<8x256xf32> to vector<8x224xf32>
    %38 = tpu.concatenate %37, %36 in 1 : vector<8x224xf32>, vector<8x32xf32> -> vector<8x256xf32>
    %cst_20 = arith.constant 0.000000e+00 : f32
    %39 = vector.broadcast %cst_20 : f32 to vector<1x256xf32>
    %40 = vector.extract_strided_slice %38 {offsets = [0, 0], sizes = [7, 256], strides = [1, 1]} : vector<8x256xf32> to vector<7x256xf32>
    %41 = tpu.concatenate %39, %40 in 0 : vector<1x256xf32>, vector<7x256xf32> -> vector<8x256xf32>
    %c2 = arith.constant 2 : index
    %c0_21 = arith.constant 0 : index
    %c0_22 = arith.constant 0 : index
    %42 = vector.load %arg5[%c2, %c0_21, %c0_22] : memref<9x1x256xf32, #tpu.memory_space<vmem>>, vector<1x1x256xf32>
    %43 = vector.shape_cast %42 : vector<1x1x256xf32> to vector<1x256xf32>
    %44 = vector.broadcast %43 : vector<1x256xf32> to vector<8x256xf32>
    %45 = arith.mulf %41, %44 : vector<8x256xf32>
    %46 = arith.addf %35, %45 : vector<8x256xf32>
    %cst_23 = arith.constant 0.000000e+00 : f32
    %47 = vector.broadcast %cst_23 : f32 to vector<8x32xf32>
    %48 = vector.extract_strided_slice %12 {offsets = [0, 0], sizes = [8, 224], strides = [1, 1]} : vector<8x256xf32> to vector<8x224xf32>
    %49 = tpu.concatenate %47, %48 in 1 : vector<8x32xf32>, vector<8x224xf32> -> vector<8x256xf32>
    %c3 = arith.constant 3 : index
    %c0_24 = arith.constant 0 : index
    %c0_25 = arith.constant 0 : index
    %50 = vector.load %arg5[%c3, %c0_24, %c0_25] : memref<9x1x256xf32, #tpu.memory_space<vmem>>, vector<1x1x256xf32>
    %51 = vector.shape_cast %50 : vector<1x1x256xf32> to vector<1x256xf32>
    %52 = vector.broadcast %51 : vector<1x256xf32> to vector<8x256xf32>
    %53 = arith.mulf %49, %52 : vector<8x256xf32>
    %54 = arith.addf %46, %53 : vector<8x256xf32>
    %cst_26 = arith.constant 0.000000e+00 : f32
    %55 = vector.broadcast %cst_26 : f32 to vector<8x32xf32>
    %56 = vector.extract_strided_slice %12 {offsets = [0, 32], sizes = [8, 224], strides = [1, 1]} : vector<8x256xf32> to vector<8x224xf32>
    %57 = tpu.concatenate %56, %55 in 1 : vector<8x224xf32>, vector<8x32xf32> -> vector<8x256xf32>
    %c5 = arith.constant 5 : index
    %c0_27 = arith.constant 0 : index
    %c0_28 = arith.constant 0 : index
    %58 = vector.load %arg5[%c5, %c0_27, %c0_28] : memref<9x1x256xf32, #tpu.memory_space<vmem>>, vector<1x1x256xf32>
    %59 = vector.shape_cast %58 : vector<1x1x256xf32> to vector<1x256xf32>
    %60 = vector.broadcast %59 : vector<1x256xf32> to vector<8x256xf32>
    %61 = arith.mulf %57, %60 : vector<8x256xf32>
    %62 = arith.addf %54, %61 : vector<8x256xf32>
    %cst_29 = arith.constant 0.000000e+00 : f32
    %63 = vector.broadcast %cst_29 : f32 to vector<8x32xf32>
    %64 = vector.extract_strided_slice %12 {offsets = [0, 0], sizes = [8, 224], strides = [1, 1]} : vector<8x256xf32> to vector<8x224xf32>
    %65 = tpu.concatenate %63, %64 in 1 : vector<8x32xf32>, vector<8x224xf32> -> vector<8x256xf32>
    %cst_30 = arith.constant 0.000000e+00 : f32
    %66 = vector.broadcast %cst_30 : f32 to vector<1x256xf32>
    %67 = vector.extract_strided_slice %65 {offsets = [1, 0], sizes = [7, 256], strides = [1, 1]} : vector<8x256xf32> to vector<7x256xf32>
    %68 = tpu.concatenate %67, %66 in 0 : vector<7x256xf32>, vector<1x256xf32> -> vector<8x256xf32>
    %c6 = arith.constant 6 : index
    %c0_31 = arith.constant 0 : index
    %c0_32 = arith.constant 0 : index
    %69 = vector.load %arg5[%c6, %c0_31, %c0_32] : memref<9x1x256xf32, #tpu.memory_space<vmem>>, vector<1x1x256xf32>
    %70 = vector.shape_cast %69 : vector<1x1x256xf32> to vector<1x256xf32>
    %71 = vector.broadcast %70 : vector<1x256xf32> to vector<8x256xf32>
    %72 = arith.mulf %68, %71 : vector<8x256xf32>
    %73 = arith.addf %62, %72 : vector<8x256xf32>
    %cst_33 = arith.constant 0.000000e+00 : f32
    %74 = vector.broadcast %cst_33 : f32 to vector<1x256xf32>
    %75 = vector.extract_strided_slice %12 {offsets = [1, 0], sizes = [7, 256], strides = [1, 1]} : vector<8x256xf32> to vector<7x256xf32>
    %76 = tpu.concatenate %75, %74 in 0 : vector<7x256xf32>, vector<1x256xf32> -> vector<8x256xf32>
    %c7 = arith.constant 7 : index
    %c0_34 = arith.constant 0 : index
    %c0_35 = arith.constant 0 : index
    %77 = vector.load %arg5[%c7, %c0_34, %c0_35] : memref<9x1x256xf32, #tpu.memory_space<vmem>>, vector<1x1x256xf32>
    %78 = vector.shape_cast %77 : vector<1x1x256xf32> to vector<1x256xf32>
    %79 = vector.broadcast %78 : vector<1x256xf32> to vector<8x256xf32>
    %80 = arith.mulf %76, %79 : vector<8x256xf32>
    %81 = arith.addf %73, %80 : vector<8x256xf32>
    %cst_36 = arith.constant 0.000000e+00 : f32
    %82 = vector.broadcast %cst_36 : f32 to vector<8x32xf32>
    %83 = vector.extract_strided_slice %12 {offsets = [0, 32], sizes = [8, 224], strides = [1, 1]} : vector<8x256xf32> to vector<8x224xf32>
    %84 = tpu.concatenate %83, %82 in 1 : vector<8x224xf32>, vector<8x32xf32> -> vector<8x256xf32>
    %cst_37 = arith.constant 0.000000e+00 : f32
    %85 = vector.broadcast %cst_37 : f32 to vector<1x256xf32>
    %86 = vector.extract_strided_slice %84 {offsets = [1, 0], sizes = [7, 256], strides = [1, 1]} : vector<8x256xf32> to vector<7x256xf32>
    %87 = tpu.concatenate %86, %85 in 0 : vector<7x256xf32>, vector<1x256xf32> -> vector<8x256xf32>
    %c8 = arith.constant 8 : index
    %c0_38 = arith.constant 0 : index
    %c0_39 = arith.constant 0 : index
    %88 = vector.load %arg5[%c8, %c0_38, %c0_39] : memref<9x1x256xf32, #tpu.memory_space<vmem>>, vector<1x1x256xf32>
    %89 = vector.shape_cast %88 : vector<1x1x256xf32> to vector<1x256xf32>
    %90 = vector.broadcast %89 : vector<1x256xf32> to vector<8x256xf32>
    %91 = arith.mulf %87, %90 : vector<8x256xf32>
    %92 = arith.addf %81, %91 : vector<8x256xf32>
    %c0_40 = arith.constant 0 : index
    %c0_41 = arith.constant 0 : index
    %93 = vector.load %arg6[%c0_40, %c0_41] : memref<1x256xf32, #tpu.memory_space<vmem>>, vector<1x256xf32>
    %94 = vector.broadcast %93 : vector<1x256xf32> to vector<8x256xf32>
    %95 = arith.mulf %92, %94 : vector<8x256xf32>
    %c0_42 = arith.constant 0 : index
    %c0_43 = arith.constant 0 : index
    %96 = vector.load %arg7[%c0_42, %c0_43] : memref<1x256xf32, #tpu.memory_space<vmem>>, vector<1x256xf32>
    %97 = vector.broadcast %96 : vector<1x256xf32> to vector<8x256xf32>
    %98 = arith.addf %95, %97 : vector<8x256xf32>
    %cst_44 = arith.constant 0.000000e+00 : f32
    %99 = vector.broadcast %cst_44 : f32 to vector<8x256xf32>
    %100 = arith.maximumf %98, %99 : vector<8x256xf32>
    %cst_45 = arith.constant 6.000000e+00 : f32
    %101 = vector.broadcast %cst_45 : f32 to vector<8x256xf32>
    %102 = arith.minimumf %100, %101 : vector<8x256xf32>
    %c0_46 = arith.constant 0 : index
    %c0_47 = arith.constant 0 : index
    %103 = vector.load %arg8[%c0_46, %c0_47] : memref<256x512xf32, #tpu.memory_space<vmem>>, vector<256x512xf32>
    %cst_48 = arith.constant dense<0.000000e+00> : vector<8x512xf32>
    %104 = tpu.matmul %102, %103, %cst_48 {dimension_numbers = #tpu.dot_dimension_numbers<[1], [0], [0], [1], [0, 0, 1, 1], [], []>} : vector<8x256xf32>, vector<256x512xf32>, vector<8x512xf32> -> vector<8x512xf32>
    %c0_49 = arith.constant 0 : index
    %c0_50 = arith.constant 0 : index
    %105 = vector.load %arg9[%c0_49, %c0_50] : memref<1x512xf32, #tpu.memory_space<vmem>>, vector<1x512xf32>
    %106 = vector.broadcast %105 : vector<1x512xf32> to vector<8x512xf32>
    %107 = arith.mulf %104, %106 : vector<8x512xf32>
    %c0_51 = arith.constant 0 : index
    %c0_52 = arith.constant 0 : index
    %108 = vector.load %arg10[%c0_51, %c0_52] : memref<1x512xf32, #tpu.memory_space<vmem>>, vector<1x512xf32>
    %109 = vector.broadcast %108 : vector<1x512xf32> to vector<8x512xf32>
    %110 = arith.addf %107, %109 : vector<8x512xf32>
    %cst_53 = arith.constant 0.000000e+00 : f32
    %111 = vector.broadcast %cst_53 : f32 to vector<8x512xf32>
    %112 = arith.maximumf %110, %111 : vector<8x512xf32>
    %cst_54 = arith.constant 6.000000e+00 : f32
    %113 = vector.broadcast %cst_54 : f32 to vector<8x512xf32>
    %114 = arith.minimumf %112, %113 : vector<8x512xf32>
    %c0_55 = arith.constant 0 : index
    %c0_56 = arith.constant 0 : index
    %115 = vector.load %arg11[%c0_55, %c0_56] : memref<8x512xf32, #tpu.memory_space<vmem>>, vector<8x512xf32>
    tpu.vector_store %arg11[%c0_55, %c0_56], %114 {strides = array<i32>} : memref<8x512xf32, #tpu.memory_space<vmem>>, vector<8x512xf32>,
    return
  }
  func.func @transform_0(%arg0: i32) -> (i32, i32) {
    %c0_i32 = arith.constant 0 : i32
    %c0_i32_0 = arith.constant 0 : i32
    return %arg0, %c0_i32 : i32, i32
  }
  func.func @transform_1(%arg0: i32) -> (i32, i32) {
    %c0_i32 = arith.constant 0 : i32
    %c0_i32_0 = arith.constant 0 : i32
    %c0_i32_1 = arith.constant 0 : i32
    return %c0_i32, %c0_i32_0 : i32, i32
  }
  func.func @transform_2(%arg0: i32) -> (i32, i32) {
    %c0_i32 = arith.constant 0 : i32
    %c0_i32_0 = arith.constant 0 : i32
    %c0_i32_1 = arith.constant 0 : i32
    return %c0_i32, %c0_i32_0 : i32, i32
  }
  func.func @transform_3(%arg0: i32) -> (i32, i32) {
    %c0_i32 = arith.constant 0 : i32
    %c0_i32_0 = arith.constant 0 : i32
    %c0_i32_1 = arith.constant 0 : i32
    return %c0_i32, %c0_i32_0 : i32, i32
  }
  func.func @transform_4(%arg0: i32) -> (i32, i32, i32) {
    %c0_i32 = arith.constant 0 : i32
    %c0_i32_0 = arith.constant 0 : i32
    %c0_i32_1 = arith.constant 0 : i32
    %c0_i32_2 = arith.constant 0 : i32
    return %c0_i32, %c0_i32_0, %c0_i32_1 : i32, i32, i32
  }
  func.func @transform_5(%arg0: i32) -> (i32, i32) {
    %c0_i32 = arith.constant 0 : i32
    %c0_i32_0 = arith.constant 0 : i32
    %c0_i32_1 = arith.constant 0 : i32
    return %c0_i32, %c0_i32_0 : i32, i32
  }
  func.func @transform_6(%arg0: i32) -> (i32, i32) {
    %c0_i32 = arith.constant 0 : i32
    %c0_i32_0 = arith.constant 0 : i32
    %c0_i32_1 = arith.constant 0 : i32
    return %c0_i32, %c0_i32_0 : i32, i32
  }
  func.func @transform_7(%arg0: i32) -> (i32, i32) {
    %c0_i32 = arith.constant 0 : i32
    %c0_i32_0 = arith.constant 0 : i32
    %c0_i32_1 = arith.constant 0 : i32
    return %c0_i32, %c0_i32_0 : i32, i32
  }
  func.func @transform_8(%arg0: i32) -> (i32, i32) {
    %c0_i32 = arith.constant 0 : i32
    %c0_i32_0 = arith.constant 0 : i32
    %c0_i32_1 = arith.constant 0 : i32
    return %c0_i32, %c0_i32_0 : i32, i32
  }
  func.func @transform_9(%arg0: i32) -> (i32, i32) {
    %c0_i32 = arith.constant 0 : i32
    %c0_i32_0 = arith.constant 0 : i32
    %c0_i32_1 = arith.constant 0 : i32
    return %c0_i32, %c0_i32_0 : i32, i32
  }
  func.func @transform_10(%arg0: i32) -> (i32, i32) {
    %c0_i32 = arith.constant 0 : i32
    %c0_i32_0 = arith.constant 0 : i32
    return %arg0, %c0_i32 : i32, i32
  }
}

</mosaic_0001>

<bundles_post_ra>
// kernel: bottom_model_forward_packed.1
= control target key start
LH: loop header
LB: loop body
LE: loop exit
PB: predicated region body
PF: predicated region fallthrough
CT: control target
= control target key end

     0   :  { %s1177_s13 = smov 0   ;;  %s1884_s0 = inlined_call_operand.vmem [shape: f32[16,216], index: 0, kind: input, shape index: {}]   ;;  %s1885_s1 = inlined_call_operand.vmem [shape: f32[216,256], index: 1, kind: input, shape index: {}]   ;;  %s1886_s2 = inlined_call_operand.vmem [shape: f32[1,256], index: 2, kind: input, shape index: {}, may-alias: {2,5}]   ;;  %s1887_s3 = inlined_call_operand.vmem [shape: f32[1,256], index: 3, kind: input, shape index: {}, may-alias: {3,6}]   ;;  %s1888_s4 = inlined_call_operand.vmem [shape: f32[9,1,256], index: 4, kind: input, shape index: {}]   ;;  %s1889_s5 = inlined_call_operand.vmem [shape: f32[1,256], index: 5, kind: input, shape index: {}, may-alias: {2,5}]   ;;  %s1890_s6 = inlined_call_operand.vmem [shape: f32[1,256], index: 6, kind: input, shape index: {}, may-alias: {3,6}]   ;;  %s1891_s7 = inlined_call_operand.vmem [shape: f32[256,512], index: 7, kind: input, shape index: {}]   ;;  %s1892_s8 = inlined_call_operand.vmem [shape: f32[1,512], index: 8, kind: input, shape index: {}]   ;;  %s1893_s9 = inlined_call_operand.vmem [shape: f32[1,512], index: 9, kind: input, shape index: {}]   ;;  %s1894_s10 = inlined_call_operand.vmem [shape: f32[16,512], index: 10, kind: output, shape index: {}]  }
   0x1 LB: > { %s1079_s14 = sadd.s32 4294967295, %s1118_s13   ;;  %p1083_p0 = scmp.ge.s32.totalorder %s1118_s13, 1  ;;  %s1118_s13 = sphi %s1177_s13, %s20_s13  }
   0x2   : > { %p312_p1 = scmp.lt.s32.totalorder %s1118_s13, 3 }
   0x4   : > { %p313_p2 = pnand %p1083_p0, %p312_p1 }
   0x5   : > { %p1250_p3 = scmp.lt.s32.totalorder (!%p313_p2), %s1079_s14, 1  ;;  %s1120_s30 = smov (!%p313_p2), 32  }
   0x6   : > { %316 = sbr.rel (%p313_p2) target bundleno = 484 (0x1e4), region = 60  ;;  %s1121_s11 = smov (!%p313_p2), 96  }
   0xb   : > { %v392_v0 = vld [vmem:[%s1885_s1 + $0xf0] sm:$0xff]  ;;  %v393_v1 = vld [vmem:[%s1885_s1 + $0xf8] sm:$0xff]  ;;  %v390_v2 = vld [vmem:[%s1885_s1 + $0xe0] sm:$0xff]  ;;  %s1897_s14 = smov (!%p1250_p3, %s1079_s14), 1  ;;  %vm416_vm0 = vcmask 719872   ;;  %vm535_vm1 = vcmask 261120  }
   0xc   : > { %420 = vmatpush.msra.mxu0 %v392_v0  ;;  %460 = vmatpush.msra.mxu2 %v393_v1  ;;  %v391_v3 = vld [vmem:[%s1885_s1 + $0xe8] sm:$0xff]  ;;  %v388_v4 = vld [vmem:[%s1885_s1 + $0xd0] sm:$0xff]  ;;  %v389_v5 = vld [vmem:[%s1885_s1 + $0xd8] sm:$0xff]  ;;  %s1100_s18 = sshll.u32 %s1897_s14, 4  ;;  %vm579_vm2 = vcmask 785408   ;;  %vm545_vm3 = vcmask 1040384  }
   0xd   : > { %v414_v6 = vld [vmem:[%s1885_s1 + $0x1a0] sm:$0xff]  ;;  %v387_v8 = vld [vmem:[%s1885_s1 + $0xc8] sm:$0xff]  ;;  %v412_v10 = vld [vmem:[%s1885_s1 + $0x190] sm:$0xff]  ;;  %s1330_s15 = scalar_lea.vmem %s1884_s0, %s1100_s18  ;;  %vm628_vm4 = vcmask 1046528   ;;  %s1101_s23 = sshll.u32 %s1897_s14, 5 }
   0xe   : > { %421 = vmatpush.msra.mxu0 %v390_v2  ;;  %461 = vmatpush.msra.mxu2 %v391_v3  ;;  %v386_v7 = vld [vmem:[%s1885_s1 + $0xc0] sm:$0xff]  ;;  %v415_v9 = vld [vmem:[%s1885_s1 + $0x1a8] sm:$0xff]  ;;  %v413_v11 = vld [vmem:[%s1885_s1 + $0x198] sm:$0xff]  ;;  %s359_s18 = scalar_lea.vmem %s1894_s10, %s1101_s23 }
   0xf   : > { %445 = vmatpush.msra.mxu1 %v414_v6  ;;  %v384_v12 = vld [vmem:[%s1885_s1 + $0xb0] sm:$0xff]  ;;  %v385_v13 = vld [vmem:[%s1885_s1 + $0xb8] sm:$0xff]  ;;  %485 = vmatpush.msra.mxu3 %v415_v9  ;;  %v410_v14 = vld [vmem:[%s1885_s1 + $0x180] sm:$0xff] }
  0x10   : > { %422 = vmatpush.msra.mxu0 %v388_v4  ;;  %462 = vmatpush.msra.mxu2 %v389_v5  ;;  %v411_v15 = vld [vmem:[%s1885_s1 + $0x188] sm:$0xff]  ;;  %v408_v16 = vld [vmem:[%s1885_s1 + $0x170] sm:$0xff]  ;;  %v382_v17 = vld [vmem:[%s1885_s1 + $0xa0] sm:$0xff] }
  0x11   : > { %446 = vmatpush.msra.mxu1 %v412_v10  ;;  %v383_v18 = vld [vmem:[%s1885_s1 + $0xa8] sm:$0xff]  ;;  %486 = vmatpush.msra.mxu3 %v413_v11  ;;  %v409_v19 = vld [vmem:[%s1885_s1 + $0x178] sm:$0xff]  ;;  %v406_v20 = vld [vmem:[%s1885_s1 + $0x160] sm:$0xff] }
  0x12   : > { %423 = vmatpush.msra.mxu0 %v386_v7  ;;  %463 = vmatpush.msra.mxu2 %v387_v8  ;;  %v380_v21 = vld [vmem:[%s1885_s1 + $0x90] sm:$0xff]  ;;  %v381_v22 = vld [vmem:[%s1885_s1 + $0x98] sm:$0xff]  ;;  %v407_v23 = vld [vmem:[%s1885_s1 + $0x168] sm:$0xff] }
  0x13   : > { %447 = vmatpush.msra.mxu1 %v410_v14  ;;  %487 = vmatpush.msra.mxu3 %v411_v15  ;;  %v404_v24 = vld [vmem:[%s1885_s1 + $0x150] sm:$0xff]  ;;  %v378_v25 = vld [vmem:[%s1885_s1 + $0x80] sm:$0xff]  ;;  %v379_v26 = vld [vmem:[%s1885_s1 + $0x88] sm:$0xff] }
  0x14   : > { %424 = vmatpush.msra.mxu0 %v384_v12  ;;  %464 = vmatpush.msra.mxu2 %v385_v13  ;;  %v405_v27 = vld [vmem:[%s1885_s1 + $0x158] sm:$0xff]  ;;  %v402_v28 = vld [vmem:[%s1885_s1 + $0x140] sm:$0xff]  ;;  %v376_v29 = vld [vmem:[%s1885_s1 + $0x70] sm:$0xff] }
  0x15   : > { %448 = vmatpush.msra.mxu1 %v408_v16  ;;  %488 = vmatpush.msra.mxu3 %v409_v19  ;;  %v377_v30 = vld [vmem:[%s1885_s1 + $0x78] sm:$0xff]  ;;  %v403_v31 = vld [vmem:[%s1885_s1 + $0x148] sm:$0xff]  ;;  %v400_v32 = vld [vmem:[%s1885_s1 + $0x130] sm:$0xff] }
  0x16   : > { %425 = vmatpush.msra.mxu0 %v382_v17  ;;  %465 = vmatpush.msra.mxu2 %v383_v18  ;;  %v374_v33 = vld [vmem:[%s1885_s1 + $0x60] sm:$0xff]  ;;  %v375_v34 = vld [vmem:[%s1885_s1 + $0x68] sm:$0xff]  ;;  %v401_v35 = vld [vmem:[%s1885_s1 + $0x138] sm:$0xff] }
  0x17   : > { %449 = vmatpush.msra.mxu1 %v406_v20  ;;  %489 = vmatpush.msra.mxu3 %v407_v23  ;;  %v398_v36 = vld [vmem:[%s1885_s1 + $0x120] sm:$0xff]  ;;  %v372_v37 = vld [vmem:[%s1885_s1 + $0x50] sm:$0xff]  ;;  %v373_v38 = vld [vmem:[%s1885_s1 + $0x58] sm:$0xff] }
  0x18   : > { %426 = vmatpush.msra.mxu0 %v380_v21  ;;  %466 = vmatpush.msra.mxu2 %v381_v22  ;;  %v399_v39 = vld [vmem:[%s1885_s1 + $0x128] sm:$0xff]  ;;  %v396_v40 = vld [vmem:[%s1885_s1 + $0x110] sm:$0xff]  ;;  %v370_v41 = vld [vmem:[%s1885_s1 + $0x40] sm:$0xff] }
  0x19   : > { %450 = vmatpush.msra.mxu1 %v404_v24  ;;  %490 = vmatpush.msra.mxu3 %v405_v27  ;;  %v371_v42 = vld [vmem:[%s1885_s1 + $0x48] sm:$0xff]  ;;  %v397_v43 = vld [vmem:[%s1885_s1 + $0x118] sm:$0xff]  ;;  %v394_v44 = vld [vmem:[%s1885_s1 + $0x100] sm:$0xff] }
  0x1a   : > { %427 = vmatpush.msra.mxu0 %v378_v25  ;;  %467 = vmatpush.msra.mxu2 %v379_v26  ;;  %v368_v45 = vld [vmem:[%s1885_s1 + $0x30] sm:$0xff]  ;;  %v369_v46 = vld [vmem:[%s1885_s1 + $0x38] sm:$0xff]  ;;  %v395_v47 = vld [vmem:[%s1885_s1 + $0x108] sm:$0xff] }
  0x1b   : > { %451 = vmatpush.msra.mxu1 %v402_v28  ;;  %491 = vmatpush.msra.mxu3 %v403_v31  ;;  %v361_v48 = vld [vmem:[%s1330_s15 + $0x8] sm:$0xff]  ;;  %v366_v49 = vld [vmem:[%s1885_s1 + $0x20] sm:$0xff]  ;;  %v364_v51 = vld [vmem:[%s1885_s1 + $0x10] sm:$0xff] }
  0x1c   : > { %428 = vmatpush.msra.mxu0 %v376_v29  ;;  %468 = vmatpush.msra.mxu2 %v377_v30  ;;  %v367_v50 = vld [vmem:[%s1885_s1 + $0x28] sm:$0xff]  ;;  %v365_v52 = vld [vmem:[%s1885_s1 + $0x18] sm:$0xff]  ;;  %v362_v53 = vld [vmem:[%s1885_s1] sm:$0xff] }
  0x1d   : > { %452 = vmatpush.msra.mxu1 %v400_v32  ;;  %492 = vmatpush.msra.mxu3 %v401_v35  ;;  %v363_v54 = vld [vmem:[%s1885_s1 + $0x8] sm:$0xff]  ;;  %v360_v55 = vld [vmem:[%s1330_s15] sm:$0xff] }
  0x1e   : > { %429 = vmatpush.msra.mxu0 %v374_v33  ;;  %469 = vmatpush.msra.mxu2 %v375_v34  ;;  %v820_v56 = vld [vmem:[%s1891_s7 + $0x3e0] sm:$0xff]  ;;  %v821_v57 = vld [vmem:[%s1891_s7 + $0x3e8] sm:$0xff] }
  0x1f   : > { %453 = vmatpush.msra.mxu1 %v398_v36  ;;  %493 = vmatpush.msra.mxu3 %v399_v39  ;;  %v756_v58 = vld [vmem:[%s1891_s7 + $0x1e0] sm:$0xff]  ;;  %v757_v60 = vld [vmem:[%s1891_s7 + $0x1e8] sm:$0xff] }
  0x20   : > { %430 = vmatpush.msra.mxu0 %v372_v37  ;;  %470 = vmatpush.msra.mxu2 %v373_v38  ;;  %v816_v59 = vld [vmem:[%s1891_s7 + $0x3c0] sm:$0xff]  ;;  %v817_v61 = vld [vmem:[%s1891_s7 + $0x3c8] sm:$0xff] }
  0x21   : > { %454 = vmatpush.msra.mxu1 %v396_v40  ;;  %494 = vmatpush.msra.mxu3 %v397_v43  ;;  %v752_v62 = vld [vmem:[%s1891_s7 + $0x1c0] sm:$0xff]  ;;  %v753_v0 = vld [vmem:[%s1891_s7 + $0x1c8] sm:$0xff] }
  0x22   : > { %431 = vmatpush.msra.mxu0 %v370_v41  ;;  %471 = vmatpush.msra.mxu2 %v371_v42  ;;  %v812_v63 = vld [vmem:[%s1891_s7 + $0x3a0] sm:$0xff]  ;;  %v813_v2 = vld [vmem:[%s1891_s7 + $0x3a8] sm:$0xff] }
  0x23   : > { %455 = vmatpush.msra.mxu1 %v394_v44  ;;  %495 = vmatpush.msra.mxu3 %v395_v47  ;;  %v1397_v1 = vld [vmem:[%s1886_s2] sm:$0x3]  ;;  %v749_v5 = vld [vmem:[%s1891_s7 + $0x1a8] sm:$0xff] }
  0x24   : > { %432 = vmatpush.msra.mxu0 %v368_v45  ;;  %472 = vmatpush.msra.mxu2 %v369_v46  ;;  %v748_v3 = vld [vmem:[%s1891_s7 + $0x1a0] sm:$0xff]  ;;  %v809_v6 = vld [vmem:[%s1891_s7 + $0x388] sm:$0xff]  ;;  %v502_v11 = vperm.slane %v1397_v1, 0  ;;  %v503_v30 = vperm.slane %v1397_v1, 1 }
  0x25   : > { %1088 = vmatmul.msk.f32.vlgmr.msra.gmra.mxu1 %vm416_vm0, %v361_v48  ;;  %1089 = vmatmul.msk.f32.vlgmr.msra.gmra.mxu3 %vm416_vm0, %v361_v48  ;;  %v808_v4 = vld [vmem:[%s1891_s7 + $0x380] sm:$0xff]  ;;  %v745_v10 = vld [vmem:[%s1891_s7 + $0x188] sm:$0xff] }
  0x26   : > { %433 = vmatpush.msra.mxu0 %v366_v49  ;;  %473 = vmatpush.msra.mxu2 %v367_v50  ;;  %v508_v8 = vld [vmem:[%s1887_s3] sm:$0x3]  ;;  %v805_v13 = vld [vmem:[%s1891_s7 + $0x368] sm:$0xff] }
  0x27   : > { %844 = vmatpush.msrb.mxu3 %v820_v56  ;;  %824 = vmatpush.msrb.mxu1 %v756_v58  ;;  %v744_v9 = vld [vmem:[%s1891_s7 + $0x180] sm:$0xff]  ;;  %v741_v16 = vld [vmem:[%s1891_s7 + $0x168] sm:$0xff]  ;;  %v510_v18 = vperm.slane %v508_v8, 0  ;;  %v511_v36 = vperm.slane %v508_v8, 1 }
  0x28   : > { %434 = vmatpush.msra.mxu0 %v364_v51  ;;  %474 = vmatpush.msra.mxu2 %v365_v52  ;;  %v804_v12 = vld [vmem:[%s1891_s7 + $0x360] sm:$0xff]  ;;  %v801_v20 = vld [vmem:[%s1891_s7 + $0x348] sm:$0xff] }
  0x29   : > { %845 = vmatpush.msrb.mxu3 %v816_v59  ;;  %825 = vmatpush.msrb.mxu1 %v752_v62  ;;  %v740_v15 = vld [vmem:[%s1891_s7 + $0x160] sm:$0xff]  ;;  %v737_v22 = vld [vmem:[%s1891_s7 + $0x148] sm:$0xff] }
  0x2a   : > { %435 = vmatpush.msra.mxu0 %v362_v53  ;;  %475 = vmatpush.msra.mxu2 %v363_v54  ;;  %v800_v19 = vld [vmem:[%s1891_s7 + $0x340] sm:$0xff]  ;;  %v797_v25 = vld [vmem:[%s1891_s7 + $0x328] sm:$0xff] }
  0x2b   : > { %436 = vmatmul.f32.vlgmr.msra.gmra.mxu0 %v360_v55  ;;  %476 = vmatmul.f32.vlgmr.msra.gmra.mxu2 %v360_v55  ;;  %v736_v21 = vld [vmem:[%s1891_s7 + $0x140] sm:$0xff]  ;;  %v733_v28 = vld [vmem:[%s1891_s7 + $0x128] sm:$0xff] }
  0x2c   : > { %884 = vmatpush.msrb.mxu2 %v821_v57  ;;  %864 = vmatpush.msrb.mxu0 %v757_v60  ;;  %v796_v24 = vld [vmem:[%s1891_s7 + $0x320] sm:$0xff]  ;;  %v793_v32 = vld [vmem:[%s1891_s7 + $0x308] sm:$0xff] }
  0x2d   : > { %846 = vmatpush.msrb.mxu3 %v812_v63  ;;  %826 = vmatpush.msrb.mxu1 %v748_v3  ;;  %v732_v27 = vld [vmem:[%s1891_s7 + $0x120] sm:$0xff]  ;;  %v729_v44 = vld [vmem:[%s1891_s7 + $0x108] sm:$0xff] }
  0x2e   : > { %885 = vmatpush.msrb.mxu2 %v817_v61  ;;  %865 = vmatpush.msrb.mxu0 %v753_v0  ;;  %v792_v31 = vld [vmem:[%s1891_s7 + $0x300] sm:$0xff]  ;;  %v789_v45 = vld [vmem:[%s1891_s7 + $0x2e8] sm:$0xff] }
  0x2f   : > { %847 = vmatpush.msrb.mxu3 %v808_v4  ;;  %827 = vmatpush.msrb.mxu1 %v744_v9  ;;  %v728_v42 = vld [vmem:[%s1891_s7 + $0x100] sm:$0xff]  ;;  %v725_v48 = vld [vmem:[%s1891_s7 + $0xe8] sm:$0xff] }
  0x30   : > { %886 = vmatpush.msrb.mxu2 %v813_v2  ;;  %866 = vmatpush.msrb.mxu0 %v749_v5  ;;  %v788_v43 = vld [vmem:[%s1891_s7 + $0x2e0] sm:$0xff]  ;;  %v785_v49 = vld [vmem:[%s1891_s7 + $0x2c8] sm:$0xff] }
  0x31   : > { %848 = vmatpush.msrb.mxu3 %v804_v12  ;;  %828 = vmatpush.msrb.mxu1 %v740_v15  ;;  %v724_v46 = vld [vmem:[%s1891_s7 + $0xe0] sm:$0xff]  ;;  %v721_v52 = vld [vmem:[%s1891_s7 + $0xc8] sm:$0xff]  ;;  %v818_v15 = vld [vmem:[%s1891_s7 + $0x3d0] sm:$0xff] }
  0x32   : > { %887 = vmatpush.msrb.mxu2 %v809_v6  ;;  %867 = vmatpush.msrb.mxu0 %v745_v10  ;;  %v784_v47 = vld [vmem:[%s1891_s7 + $0x2c0] sm:$0xff]  ;;  %v781_v53 = vld [vmem:[%s1891_s7 + $0x2a8] sm:$0xff]  ;;  %v822_v10 = vld [vmem:[%s1891_s7 + $0x3f0] sm:$0xff] }
  0x33   : > { %849 = vmatpush.msrb.mxu3 %v800_v19  ;;  %829 = vmatpush.msrb.mxu1 %v736_v21  ;;  %v720_v50 = vld [vmem:[%s1891_s7 + $0xc0] sm:$0xff]  ;;  %v717_v56 = vld [vmem:[%s1891_s7 + $0xa8] sm:$0xff]  ;;  %v814_v19 = vld [vmem:[%s1891_s7 + $0x3b0] sm:$0xff] }
  0x34   : > { %888 = vmatpush.msrb.mxu2 %v805_v13  ;;  %868 = vmatpush.msrb.mxu0 %v741_v16  ;;  %v780_v51 = vld [vmem:[%s1891_s7 + $0x2a0] sm:$0xff]  ;;  %v777_v57 = vld [vmem:[%s1891_s7 + $0x288] sm:$0xff]  ;;  %v759_v16 = vld [vmem:[%s1891_s7 + $0x1f8] sm:$0xff] }
  0x35   : > { %850 = vmatpush.msrb.mxu3 %v796_v24  ;;  %830 = vmatpush.msrb.mxu1 %v732_v27  ;;  %v716_v54 = vld [vmem:[%s1891_s7 + $0xa0] sm:$0xff]  ;;  %v713_v60 = vld [vmem:[%s1891_s7 + $0x88] sm:$0xff]  ;;  %v815_v21 = vld [vmem:[%s1891_s7 + $0x3b8] sm:$0xff] }
  0x36   : > { %889 = vmatpush.msrb.mxu2 %v801_v20  ;;  %869 = vmatpush.msrb.mxu0 %v737_v22  ;;  %v776_v55 = vld [vmem:[%s1891_s7 + $0x280] sm:$0xff]  ;;  %v773_v61 = vld [vmem:[%s1891_s7 + $0x268] sm:$0xff]  ;;  %v755_v20 = vld [vmem:[%s1891_s7 + $0x1d8] sm:$0xff] }
  0x37   : > { %851 = vmatpush.msrb.mxu3 %v792_v31  ;;  %831 = vmatpush.msrb.mxu1 %v728_v42  ;;  %v712_v58 = vld [vmem:[%s1891_s7 + $0x80] sm:$0xff]  ;;  %v709_v0 = vld [vmem:[%s1891_s7 + $0x68] sm:$0xff]  ;;  %v750_v22 = vld [vmem:[%s1891_s7 + $0x1b0] sm:$0xff] }
  0x38   : > { %890 = vmatpush.msrb.mxu2 %v797_v25  ;;  %870 = vmatpush.msrb.mxu0 %v733_v28  ;;  %v772_v59 = vld [vmem:[%s1891_s7 + $0x260] sm:$0xff]  ;;  %v769_v1 = vld [vmem:[%s1891_s7 + $0x248] sm:$0xff]  ;;  %v751_v24 = vld [vmem:[%s1891_s7 + $0x1b8] sm:$0xff] }
  0x39   : > { %852 = vmatpush.msrb.mxu3 %v788_v43  ;;  %832 = vmatpush.msrb.mxu1 %v724_v46  ;;  %v708_v62 = vld [vmem:[%s1891_s7 + $0x60] sm:$0xff]  ;;  %v705_v4 = vld [vmem:[%s1891_s7 + $0x48] sm:$0xff]  ;;  %v811_v25 = vld [vmem:[%s1891_s7 + $0x398] sm:$0xff] }
  0x3a   : > { %891 = vmatpush.msrb.mxu2 %v793_v32  ;;  %871 = vmatpush.msrb.mxu0 %v729_v44  ;;  %v768_v63 = vld [vmem:[%s1891_s7 + $0x240] sm:$0xff]  ;;  %v765_v5 = vld [vmem:[%s1891_s7 + $0x228] sm:$0xff]  ;;  %v806_v27 = vld [vmem:[%s1891_s7 + $0x370] sm:$0xff] }
  0x3b   : > { %853 = vmatpush.msrb.mxu3 %v784_v47  ;;  %833 = vmatpush.msrb.mxu1 %v720_v50  ;;  %v704_v2 = vld [vmem:[%s1891_s7 + $0x40] sm:$0xff]  ;;  %v701_v8 = vld [vmem:[%s1891_s7 + $0x28] sm:$0xff]  ;;  %v747_v28 = vld [vmem:[%s1891_s7 + $0x198] sm:$0xff] }
  0x3c   : > { %892 = vmatpush.msrb.mxu2 %v789_v45  ;;  %872 = vmatpush.msrb.mxu0 %v725_v48  ;;  %v764_v3 = vld [vmem:[%s1891_s7 + $0x220] sm:$0xff]  ;;  %v761_v9 = vld [vmem:[%s1891_s7 + $0x208] sm:$0xff]  ;;  %v802_v31 = vld [vmem:[%s1891_s7 + $0x350] sm:$0xff] }
  0x3d   : > { %854 = vmatpush.msrb.mxu3 %v780_v51  ;;  %834 = vmatpush.msrb.mxu1 %v716_v54  ;;  %v700_v6 = vld [vmem:[%s1891_s7 + $0x20] sm:$0xff]  ;;  %v697_v13 = vld [vmem:[%s1891_s7 + $0x8] sm:$0xff]  ;;  %v743_v32 = vld [vmem:[%s1891_s7 + $0x178] sm:$0xff] }
  0x3e   : > { %893 = vmatpush.msrb.mxu2 %v785_v49  ;;  %873 = vmatpush.msrb.mxu0 %v721_v52  ;;  %v696_v12 = vld [vmem:[%s1891_s7] sm:$0xff]  ;;  %v735_v42 = vld [vmem:[%s1891_s7 + $0x138] sm:$0xff]  ;;  %v730_v44 = vld [vmem:[%s1891_s7 + $0x110] sm:$0xff] }
  0x3f   : > { %855 = vmatpush.msrb.mxu3 %v776_v55  ;;  %835 = vmatpush.msrb.mxu1 %v712_v58  ;;  %v795_v43 = vld [vmem:[%s1891_s7 + $0x318] sm:$0xff]  ;;  %v790_v45 = vld [vmem:[%s1891_s7 + $0x2f0] sm:$0xff]  ;;  %v1697_v54 = vld [vmem:[%s1888_s4 + $0x8] sm:$0x3] }
  0x40   : > { %894 = vmatpush.msrb.mxu2 %v781_v53  ;;  %874 = vmatpush.msrb.mxu0 %v717_v56  ;;  %v731_v47 = vld [vmem:[%s1891_s7 + $0x118] sm:$0xff]  ;;  %v726_v50 = vld [vmem:[%s1891_s7 + $0xf0] sm:$0xff] }
  0x41   : > { %856 = vmatpush.msrb.mxu3 %v772_v59  ;;  %836 = vmatpush.msrb.mxu1 %v708_v62  ;;  %v791_v48 = vld [vmem:[%s1891_s7 + $0x2f8] sm:$0xff]  ;;  %v786_v51 = vld [vmem:[%s1891_s7 + $0x2d0] sm:$0xff] }
  0x42   : > { %895 = vmatpush.msrb.mxu2 %v777_v57  ;;  %875 = vmatpush.msrb.mxu0 %v713_v60  ;;  %v727_v52 = vld [vmem:[%s1891_s7 + $0xf8] sm:$0xff]  ;;  %v722_v55 = vld [vmem:[%s1891_s7 + $0xd0] sm:$0xff]  ;;  %v1708_v57 = vld [vmem:[%s1888_s4] sm:$0x3] }
  0x43   : > { %857 = vmatpush.msrb.mxu3 %v768_v63  ;;  %837 = vmatpush.msrb.mxu1 %v704_v2  ;;  %v787_v53 = vld [vmem:[%s1891_s7 + $0x2d8] sm:$0xff]  ;;  %v782_v56 = vld [vmem:[%s1891_s7 + $0x2b0] sm:$0xff] }
  0x44   : > { %896 = vmatpush.msrb.mxu2 %v773_v61  ;;  %876 = vmatpush.msrb.mxu0 %v709_v0  ;;  %v723_v59 = vld [vmem:[%s1891_s7 + $0xd8] sm:$0xff]  ;;  %v1720_v61 = vld [vmem:[%s1888_s4 + $0x2] sm:$0x3]  ;;  %v718_v62 = vld [vmem:[%s1891_s7 + $0xb0] sm:$0xff] }
  0x45   : > { %858 = vmatpush.msrb.mxu3 %v764_v3  ;;  %838 = vmatpush.msrb.mxu1 %v700_v6  ;;  %v783_v60 = vld [vmem:[%s1891_s7 + $0x2b8] sm:$0xff]  ;;  %v778_v63 = vld [vmem:[%s1891_s7 + $0x290] sm:$0xff] }
  0x46   : > { %897 = vmatpush.msrb.mxu2 %v769_v1  ;;  %877 = vmatpush.msrb.mxu0 %v705_v4  ;;  %v1733_v1 = vld [vmem:[%s1888_s4 + $0xe] sm:$0x3]  ;;  %v719_v2 = vld [vmem:[%s1891_s7 + $0xb8] sm:$0xff]  ;;  %v550_v4 = vperm.slane %v1708_v57, 0 }
  0x47   : > { %839 = vmatpush.msrb.mxu1 %v696_v12  ;;  %v779_v3 = vld [vmem:[%s1891_s7 + $0x298] sm:$0xff]  ;;  %v568_v12 = vperm.slane %v1720_v61, 1 }
  0x48   : > { %898 = vmatpush.msrb.mxu2 %v765_v5  ;;  %878 = vmatpush.msrb.mxu0 %v701_v8  ;;  %v774_v8 = vld [vmem:[%s1891_s7 + $0x270] sm:$0xff] }
  0x4a   : > { %899 = vmatpush.msrb.mxu2 %v761_v9  ;;  %879 = vmatpush.msrb.mxu0 %v697_v13  ;;  %v523_v9 = vperm.slane %v1697_v54, 0 }
  0x4c   : > { %944 = vmatpush.msra.mxu0 %v759_v16  ;;  %v1766_v16 = vld [vmem:[%s1888_s4 + $0x6] sm:$0x3] }
  0x4e   : > { %945 = vmatpush.msra.mxu0 %v755_v20  ;;  %v710_v20 = vld [vmem:[%s1891_s7 + $0x70] sm:$0xff] }
  0x50   : > { %946 = vmatpush.msra.mxu0 %v751_v24 }
  0x52   : > { %947 = vmatpush.msra.mxu0 %v747_v28 }
  0x54   : > { %948 = vmatpush.msra.mxu0 %v743_v32  ;;  %v766_v32 = vld [vmem:[%s1891_s7 + $0x230] sm:$0xff] }
  0xa2   : > { %v457_v7 = vpop.f32.mrf.mxu1 }
  0xa8   : > { %v437_v14 = vpop.f32.mrf.mxu0  ;;  %v497_v26 = vpop.f32.mrf.mxu3 }
  0xa9   : > { %v458_v17 = vadd.f32 %v457_v7, %v437_v14  ;;  %v760_v7 = vld [vmem:[%s1891_s7 + $0x200] sm:$0xff]  ;;  %v758_v14 = vld [vmem:[%s1891_s7 + $0x1f0] sm:$0xff] }
  0xaa   : > { %859 = vmatpush.msrb.mxu3 %v760_v7  ;;  %904 = vmatpush.msra.mxu1 %v758_v14  ;;  %v714_v7 = vld [vmem:[%s1891_s7 + $0x90] sm:$0xff]  ;;  %v715_v14 = vld [vmem:[%s1891_s7 + $0x98] sm:$0xff] }
  0xab   : > { %v506_v23 = vmul.f32 %v502_v11, %v458_v17  ;;  %v823_v11 = vld [vmem:[%s1891_s7 + $0x3f8] sm:$0xff] }
  0xac   : > { %924 = vmatpush.msra.mxu3 %v822_v10  ;;  %964 = vmatpush.msra.mxu2 %v823_v11  ;;  %v819_v17 = vld [vmem:[%s1891_s7 + $0x3d8] sm:$0xff]  ;;  %v524_v11 = vperm.slane %v1697_v54, 1 }
  0xad   : > { %v514_v29 = vadd.f32 %v510_v18, %v506_v23  ;;  %v754_v18 = vld [vmem:[%s1891_s7 + $0x1d0] sm:$0xff]  ;;  %v763_v54 = vld [vmem:[%s1891_s7 + $0x218] sm:$0xff] }
  0xae   : > { %v477_v33 = vpop.f32.mrf.mxu2  ;;  %925 = vmatpush.msra.mxu3 %v818_v15  ;;  %965 = vmatpush.msra.mxu2 %v819_v17  ;;  %v810_v23 = vld [vmem:[%s1891_s7 + $0x390] sm:$0xff]  ;;  %v775_v15 = vld [vmem:[%s1891_s7 + $0x278] sm:$0xff]  ;;  %v551_v17 = vperm.slane %v1708_v57, 1 }
  0xaf   : > { %v516_v34 = vmax.f32 %v514_v29, 0.0  ;;  %v498_v35 = vadd.f32 %v497_v26, %v477_v33  ;;  %905 = vmatpush.msra.mxu1 %v754_v18  ;;  %v746_v26 = vld [vmem:[%s1891_s7 + $0x190] sm:$0xff]  ;;  %v807_v29 = vld [vmem:[%s1891_s7 + $0x378] sm:$0xff] }
  0xb0   : > { %926 = vmatpush.msra.mxu3 %v814_v19  ;;  %966 = vmatpush.msra.mxu2 %v815_v21  ;;  %v803_v33 = vld [vmem:[%s1891_s7 + $0x358] sm:$0xff]  ;;  %v770_v21 = vld [vmem:[%s1891_s7 + $0x250] sm:$0xff] }
  0xb1   : > { %v1467_v37 = vmin.f32 %v516_v34, 6.0  ;;  %v507_v38 = vmul.f32 %v503_v30, %v498_v35  ;;  %906 = vmatpush.msra.mxu1 %v750_v22  ;;  %v742_v30 = vld [vmem:[%s1891_s7 + $0x170] sm:$0xff]  ;;  %v1782_v22 = vld [vmem:[%s1888_s4 + $0x4] sm:$0x3] }
  0xb2   : > { %927 = vmatpush.msra.mxu3 %v810_v23  ;;  %967 = vmatpush.msra.mxu2 %v811_v25  ;;  %v738_v34 = vld [vmem:[%s1891_s7 + $0x150] sm:$0xff]  ;;  %v711_v25 = vld [vmem:[%s1891_s7 + $0x78] sm:$0xff]  ;;  %v594_v57 = vperm.slane %v1782_v22, 0 }
  0xb3   : > { %v515_v39 = vadd.f32 %v511_v36, %v507_v38  ;;  %531 = vrot.lane.b32.xlu0 %v1467_v37, %s1120_s30  ;;  %907 = vmatpush.msra.mxu1 %v746_v26  ;;  %v798_v35 = vld [vmem:[%s1891_s7 + $0x330] sm:$0xff]  ;;  %v739_v36 = vld [vmem:[%s1891_s7 + $0x158] sm:$0xff]  ;;  %v558_v19 = vrot.slane %v1467_v37, 7 }
  0xb4   : > { %928 = vmatpush.msra.mxu3 %v806_v27  ;;  %968 = vmatpush.msra.mxu2 %v807_v29  ;;  %v799_v38 = vld [vmem:[%s1891_s7 + $0x338] sm:$0xff]  ;;  %v567_v29 = vperm.slane %v1720_v61, 0 }
  0xb5   : > { %v517_v40 = vmax.f32 %v515_v39, 0.0  ;;  %908 = vmatpush.msra.mxu1 %v742_v30  ;;  %v734_v39 = vld [vmem:[%s1891_s7 + $0x130] sm:$0xff]  ;;  %949 = vmatpush.msra.mxu0 %v739_v36  ;;  %v771_v26 = vld [vmem:[%s1891_s7 + $0x258] sm:$0xff]  ;;  %v651_v30 = vperm.slane %v1733_v1, 0 }
  0xb6   : > { %929 = vmatpush.msra.mxu3 %v802_v31  ;;  %969 = vmatpush.msra.mxu2 %v803_v33  ;;  %v706_v31 = vld [vmem:[%s1891_s7 + $0x50] sm:$0xff]  ;;  %v605_v33 = vperm.slane %v1766_v16, 0 }
  0xb7   : > { %v1470_v41 = vmin.f32 %v517_v40, 6.0  ;;  %909 = vmatpush.msra.mxu1 %v738_v34  ;;  %v794_v40 = vld [vmem:[%s1891_s7 + $0x310] sm:$0xff]  ;;  %950 = vmatpush.msra.mxu0 %v735_v42  ;;  %v527_v34 = vmul.f32 %v523_v9, %v1467_v37 }
  0xb8   : > { %930 = vmatpush.msra.mxu3 %v798_v35  ;;  %970 = vmatpush.msra.mxu2 %v799_v38  ;;  %v652_v35 = vperm.slane %v1733_v1, 1  ;;  %v707_v38 = vld [vmem:[%s1891_s7 + $0x58] sm:$0xff] }
  0xb9   : > { %577 = vrot.lane.b32.xlu1 %v1470_v41, %s1121_s11  ;;  %910 = vmatpush.msra.mxu1 %v734_v39  ;;  %v559_v6 = vrot.slane %v1470_v41, 7  ;;  %v767_v39 = vld [vmem:[%s1891_s7 + $0x238] sm:$0xff]  ;;  %v528_v42 = vmul.f32 %v524_v11, %v1470_v41 }
  0xba   : > { %931 = vmatpush.msra.mxu3 %v794_v40  ;;  %971 = vmatpush.msra.mxu2 %v795_v43  ;;  %v595_v40 = vperm.slane %v1782_v22, 1 }
  0xbb   : > { %533 = vrot.lane.b32.xlu0 %v1470_v41, %s1120_s30  ;;  %911 = vmatpush.msra.mxu1 %v730_v44  ;;  %v563_v28 = vsel %vm545_vm3, 0.0, %v559_v6  ;;  %v562_v44 = vsel %vm545_vm3, 0.0, %v558_v19 }
  0xbc   : > { %932 = vmatpush.msra.mxu3 %v790_v45  ;;  %951 = vmatpush.msra.mxu0 %v731_v47  ;;  %v702_v45 = vld [vmem:[%s1891_s7 + $0x30] sm:$0xff]  ;;  %v1094_v47 = vld [vmem:[%s1888_s4 + $0xa] sm:$0x3] }
  0xbd   : > { %972 = vmatpush.msra.mxu2 %v791_v48  ;;  %912 = vmatpush.msra.mxu1 %v726_v50  ;;  %v572_v50 = vmul.f32 %v568_v12, %v563_v28 }
  0xbe   : > { %933 = vmatpush.msra.mxu3 %v786_v51  ;;  %952 = vmatpush.msra.mxu0 %v727_v52  ;;  %v606_v51 = vperm.slane %v1766_v16, 1 }
  0xbf   : > { %973 = vmatpush.msra.mxu2 %v787_v53  ;;  %913 = vmatpush.msra.mxu1 %v722_v55  ;;  %v703_v53 = vld [vmem:[%s1891_s7 + $0x38] sm:$0xff] }
  0xc0   : > { %934 = vmatpush.msra.mxu3 %v782_v56  ;;  %953 = vmatpush.msra.mxu0 %v723_v59  ;;  %v698_v59 = vld [vmem:[%s1891_s7 + $0x10] sm:$0xff] }
  0xc1   : > { %575 = vrot.lane.b32.xlu1 %v1467_v37, %s1121_s11  ;;  %974 = vmatpush.msra.mxu2 %v783_v60  ;;  %v643_v60 = vrot.slane %v1470_v41, 1 }
  0xc2   : > { %914 = vmatpush.msra.mxu1 %v718_v62  ;;  %935 = vmatpush.msra.mxu3 %v778_v63  ;;  %v642_v63 = vrot.slane %v1467_v37, 1  ;;  %v616_v37 = vperm.slane %v1094_v47, 0 }
  0xc3   : > { %954 = vmatpush.msra.mxu0 %v719_v2  ;;  %975 = vmatpush.msra.mxu2 %v779_v3  ;;  %v699_v2 = vld [vmem:[%s1891_s7 + $0x18] sm:$0xff]  ;;  %v617_v3 = vperm.slane %v1094_v47, 1 }
  0xc4   : > { %915 = vmatpush.msra.mxu1 %v714_v7  ;;  %936 = vmatpush.msra.mxu3 %v774_v8  ;;  %v571_v7 = vmul.f32 %v567_v29, %v562_v44 }
  0xc5   : > { %955 = vmatpush.msra.mxu0 %v715_v14  ;;  %976 = vmatpush.msra.mxu2 %v775_v15 }
  0xc6   : > { %916 = vmatpush.msra.mxu1 %v710_v20  ;;  %937 = vmatpush.msra.mxu3 %v770_v21 }
  0xc7   : > { %956 = vmatpush.msra.mxu0 %v711_v25  ;;  %977 = vmatpush.msra.mxu2 %v771_v26 }
  0xc8   : > { %917 = vmatpush.msra.mxu1 %v706_v31  ;;  %938 = vmatpush.msra.mxu3 %v766_v32 }
  0xc9   : > { %957 = vmatpush.msra.mxu0 %v707_v38  ;;  %978 = vmatpush.msra.mxu2 %v767_v39 }
  0xca   : > { %918 = vmatpush.msra.mxu1 %v702_v45 }
  0xcb   : > { %958 = vmatpush.msra.mxu0 %v703_v53  ;;  %979 = vmatpush.msra.mxu2 %v763_v54 }
  0xcc   : > { %919 = vmatpush.msra.mxu1 %v698_v59 }
  0xcd   : > { %959 = vmatpush.msra.mxu0 %v699_v2 }
 0x125   : > { %v532_v46 = vpop.permute.xlu0 %531 }
 0x126   : > { %v1680_v49 = vsel %vm535_vm1, 0.0, %v532_v46 }
 0x127   : > { %v541_v58 = vrot.slane %v1680_v49, 7  ;;  %v624_v41 = vrot.slane %v1680_v49, 1  ;;  %v609_v20 = vmul.f32 %v605_v33, %v1680_v49  ;;  %v676_v49 = vld [vmem:[%s1889_s5] sm:$0x3] }
 0x128   : > { %v679_v45 = vperm.slane %v676_v49, 1 }
 0x129   : > { %v546_v10 = vsel %vm545_vm3, 0.0, %v541_v58 }
 0x12a   : > { %v554_v27 = vmul.f32 %v550_v4, %v546_v10  ;;  %v1097_v10 = vld [vmem:[%s1888_s4 + $0x10] sm:$0x3] }
 0x12b   : > { %v1728_v0 = vpop.permute.xlu1 %577  ;;  %v669_v25 = vperm.slane %v1097_v10, 1 }
 0x12c   : > { %v1744_v5 = vsel %vm579_vm2, %v1728_v0, 0.0  ;;  %v556_v55 = vadd.f32 %v554_v27, %v527_v34 }
 0x12d   : > { %v534_v13 = vpop.permute.xlu0 %533  ;;  %v586_v23 = vrot.slane %v1744_v5, 7  ;;  %v660_v16 = vrot.slane %v1744_v5, 1  ;;  %v621_v21 = vmul.f32 %v617_v3, %v1744_v5 }
 0x12e   : > { %v1770_v18 = vsel %vm535_vm1, %v532_v46, %v534_v13  ;;  %v762_v46 = vld [vmem:[%s1891_s7 + $0x210] sm:$0xff]  ;;  %v573_v13 = vadd.f32 %v571_v7, %v556_v55 }
 0x12f   : > { %v542_v24 = vrot.slane %v1770_v18, 7  ;;  %v590_v48 = vsel %vm545_vm3, 0.0, %v586_v23  ;;  %v625_v61 = vrot.slane %v1770_v18, 1  ;;  %939 = vmatpush.msra.mxu3 %v762_v46  ;;  %v610_v12 = vmul.f32 %v606_v51, %v1770_v18 }
 0x130   : > { %v599_v4 = vmul.f32 %v595_v40, %v590_v48  ;;  %v646_v18 = vsel %vm628_vm4, %v642_v63, 0.0  ;;  %v664_v32 = vsel %vm628_vm4, %v660_v16, 0.0  ;;  %v678_v46 = vperm.slane %v676_v49, 0  ;;  %v998_v63 = vld [vmem:[%s1893_s9] sm:$0xf] }
 0x131   : > { %v547_v36 = vsel %vm545_vm3, 0.0, %v542_v24  ;;  %v630_v19 = vsel %vm628_vm4, %v625_v61, 0.0  ;;  %v629_v24 = vsel %vm628_vm4, %v624_v41, 0.0  ;;  %v655_v39 = vmul.f32 %v651_v30, %v646_v18 }
 0x132   : > { %v555_v43 = vmul.f32 %v551_v17, %v547_v36  ;;  %v647_v17 = vsel %vm628_vm4, %v643_v60, 0.0  ;;  %v668_v36 = vperm.slane %v1097_v10, 0  ;;  %v984_v60 = vld [vmem:[%s1892_s8] sm:$0xf]  ;;  %v1000_v7 = vperm.slane %v998_v63, 0 }
 0x133   : > { %v576_v52 = vpop.permute.xlu1 %575  ;;  %v656_v34 = vmul.f32 %v652_v35, %v647_v17  ;;  %v986_v2 = vperm.slane %v984_v60, 0  ;;  %v988_v16 = vperm.slane %v984_v60, 2  ;;  %v989_v17 = vperm.slane %v984_v60, 3 }
 0x134   : > { %v557_v56 = vadd.f32 %v555_v43, %v528_v42  ;;  %v580_v58 = vsel %vm579_vm2, %v576_v52, %v1728_v0  ;;  %v1095_v0 = vld [vmem:[%s1888_s4 + $0xc] sm:$0x3]  ;;  %v684_v42 = vld [vmem:[%s1890_s6] sm:$0x3]  ;;  %v673_v43 = vmul.f32 %v669_v25, %v664_v32 }
 0x135   : > { %v585_v62 = vrot.slane %v580_v58, 7  ;;  %v635_v8 = vperm.slane %v1095_v0, 1  ;;  %v634_v15 = vperm.slane %v1095_v0, 0  ;;  %v659_v26 = vrot.slane %v580_v58, 1 }
 0x136   : > { %v574_v6 = vadd.f32 %v572_v50, %v557_v56  ;;  %v620_v31 = vmul.f32 %v616_v37, %v580_v58  ;;  %v687_v51 = vperm.slane %v684_v42, 1  ;;  %v686_v54 = vperm.slane %v684_v42, 0 }
 0x137   : > { %v589_v9 = vsel %vm545_vm3, 0.0, %v585_v62  ;;  %v639_v28 = vmul.f32 %v635_v8, %v630_v19  ;;  %v638_v5 = vmul.f32 %v634_v15, %v629_v24  ;;  %v663_v40 = vsel %vm628_vm4, %v659_v26, 0.0 }
 0x138   : > { %v601_v11 = vadd.f32 %v599_v4, %v574_v6  ;;  %v598_v14 = vmul.f32 %v594_v57, %v589_v9  ;;  %v672_v48 = vmul.f32 %v668_v36, %v663_v40  ;;  %v987_v0 = vperm.slane %v984_v60, 1 }
 0x139   : > { %v1001_v8 = vperm.slane %v998_v63, 1 }
 0x13a   : > { %v612_v22 = vadd.f32 %v610_v12, %v601_v11  ;;  %v600_v23 = vadd.f32 %v598_v14, %v573_v13 }
 0x13c   : > { %v623_v27 = vadd.f32 %v621_v21, %v612_v22  ;;  %v611_v29 = vadd.f32 %v609_v20, %v600_v23  ;;  %v1002_v20 = vperm.slane %v998_v63, 2  ;;  %v1003_v22 = vperm.slane %v998_v63, 3 }
 0x13e   : > { %v641_v33 = vadd.f32 %v639_v28, %v623_v27  ;;  %v622_v38 = vadd.f32 %v620_v31, %v611_v29 }
 0x140   : > { %v658_v44 = vadd.f32 %v656_v34, %v641_v33  ;;  %v640_v35 = vadd.f32 %v638_v5, %v622_v38 }
 0x142   : > { %v657_v47 = vadd.f32 %v655_v39, %v640_v35  ;;  %v675_v50 = vadd.f32 %v673_v43, %v658_v44 }
 0x144   : > { %v674_v52 = vadd.f32 %v672_v48, %v657_v47  ;;  %v683_v53 = vmul.f32 %v679_v45, %v675_v50 }
 0x146   : > { %v691_v1 = vadd.f32 %v687_v51, %v683_v53  ;;  %v682_v30 = vmul.f32 %v678_v46, %v674_v52 }
 0x148   : > { %v693_v55 = vmax.f32 %v691_v1, 0.0  ;;  %v690_v56 = vadd.f32 %v686_v54, %v682_v30 }
 0x14a   : > { %v695_v57 = vmin.f32 %v693_v55, 6.0  ;;  %v692_v58 = vmax.f32 %v690_v56, 0.0 }
 0x14c   : > { %860 = vmatmul.f32.vlgmr.msrb.gmra.mxu3 %v695_v57  ;;  %900 = vmatmul.f32.vlgmr.msrb.gmra.mxu2 %v695_v57  ;;  %v694_v59 = vmin.f32 %v692_v58, 6.0 }
 0x14e   : > { %840 = vmatmul.f32.vlgmr.msrb.gmra.mxu1 %v694_v59  ;;  %880 = vmatmul.f32.vlgmr.msrb.gmra.mxu0 %v694_v59 }
 0x154   : > { %940 = vmatmul.f32.vlgmr.msra.gmra.mxu3 %v695_v57  ;;  %980 = vmatmul.f32.vlgmr.msra.gmra.mxu2 %v695_v57 }
 0x156   : > { %920 = vmatmul.f32.vlgmr.msra.gmra.mxu1 %v694_v59  ;;  %960 = vmatmul.f32.vlgmr.msra.gmra.mxu0 %v694_v59 }
 0x1cb   : > { %v841_v61 = vpop.f32.mrf.mxu1  ;;  %v881_v62 = vpop.f32.mrf.mxu0 }
 0x1cf   : > { %v861_v3 = vpop.f32.mrf.mxu3  ;;  %v901_v4 = vpop.f32.mrf.mxu2 }
 0x1d0   : > { %v862_v6 = vadd.f32 %v861_v3, %v841_v61  ;;  %v902_v41 = vadd.f32 %v901_v4, %v881_v62 }
 0x1d2   : > { %v994_v37 = vmul.f32 %v986_v2, %v862_v6  ;;  %v995_v9 = vmul.f32 %v987_v0, %v902_v41 }
 0x1d3   : > { %v921_v14 = vpop.f32.mrf.mxu1  ;;  %v961_v15 = vpop.f32.mrf.mxu0 }
 0x1d4   : > { %v1008_v10 = vadd.f32 %v1000_v7, %v994_v37  ;;  %v1009_v11 = vadd.f32 %v1001_v8, %v995_v9 }
 0x1d6   : > { %v1012_v12 = vmax.f32 %v1008_v10, 0.0  ;;  %v1013_v13 = vmax.f32 %v1009_v11, 0.0 }
 0x1d7   : > { %v941_v19 = vpop.f32.mrf.mxu3  ;;  %v981_v21 = vpop.f32.mrf.mxu2 }
 0x1d8   : > { %v1016_v23 = vmin.f32 %v1012_v12, 6.0  ;;  %v1017_v24 = vmin.f32 %v1013_v13, 6.0  ;;  %v942_v25 = vadd.f32 %v941_v19, %v921_v14  ;;  %v982_v18 = vadd.f32 %v981_v21, %v961_v15 }
 0x1da   : > { %1020 = vst [vmem:[%s359_s18] sm:$0xff] %v1016_v23  ;;  %v996_v26 = vmul.f32 %v988_v16, %v942_v25  ;;  %v997_v27 = vmul.f32 %v989_v17, %v982_v18 }
 0x1db   : > { %1021 = vst [vmem:[%s359_s18 + $0x8] sm:$0xff] %v1017_v24 }
 0x1dc   : > { %v1010_v28 = vadd.f32 %v1002_v20, %v996_v26  ;;  %v1011_v29 = vadd.f32 %v1003_v22, %v997_v27 }
 0x1de   : > { %v1014_v31 = vmax.f32 %v1010_v28, 0.0  ;;  %v1015_v32 = vmax.f32 %v1011_v29, 0.0 }
 0x1e0   : > { %v1018_v34 = vmin.f32 %v1014_v31, 6.0  ;;  %v1019_v49 = vmin.f32 %v1015_v32, 6.0 }
 0x1e2   : > { %1022 = vst [vmem:[%s359_s18 + $0x10] sm:$0xff] %v1018_v34 }
 0x1e3   : > { %1023 = vst [vmem:[%s359_s18 + $0x18] sm:$0xff] %v1019_v49 }
 0x1e4 PF: > { %s20_s13 = sadd.s32 1, %s1118_s13  }
 0x1e5   : > { %p17_p4 = scmp.ge.s32.totalorder %s20_s13, 4  }
 0x1e7   :  { %19 = sbr.rel (!%p17_p4) target bundleno = 1 (0x1), region = 98 }

</bundles_post_ra>
